<compile_context>
chip_gen: v6e
topology: v6e:2x2x1
jax: 0.10.0
libtpu: 0.0.40
codegen_flags: <defaults>
</compile_context>

<pallas_src>
import math

import jax
import jax.numpy as jnp
from jax import lax
from jax.experimental import pallas as pl
from jax.experimental.pallas import tpu as pltpu


def _round_up(x, m):
    return ((x + m - 1) // m) * m


def _gemv_kernel(ws_ref, f_ref, o_ref):
    # ws_ref: (1, H)   grid-invariant row vector (weight @ summary)
    # f_ref : (TM, H)  tile of features
    # o_ref : (1, TM)  lane-dense output row block
    o_ref[...] = lax.dot_general(
        ws_ref[...],
        f_ref[...],
        dimension_numbers=(((1,), (1,)), ((), ())),  # contract on H
        preferred_element_type=jnp.float32,
    ).astype(o_ref.dtype)


def discriminator_forward(features, weight, summary, *, block_rows=512):
    """features: (N, H), weight: (H, H), summary: (H,)  ->  (N,)."""
    n, h = features.shape
    dtype = features.dtype

    # Hoist the tiny (H,H) @ (H,) GEMV out of the kernel: removes 4*H^2 bytes
    # of HBM traffic / VMEM residency from the memory-bound streaming kernel.
    ws = jnp.dot(weight, summary).reshape(1, h).astype(dtype)

    # ---- choose the row tile TM -------------------------------------------
    # Keep double-buffered feature tiles well inside the 32 MiB scoped VMEM
    # default (portable to v7x's 64 MiB physical VMEM).
    vmem_budget = 24 * 1024 * 1024
    bytes_per_row = h * jnp.dtype(dtype).itemsize
    tm_cap = max(128, (vmem_budget // (2 * bytes_per_row)) // 128 * 128)
    tm = min(block_rows, tm_cap)          # multiple of 128
    n_r8 = _round_up(n, 8)
    if n_r8 < tm:
        tm = n_r8                          # tiny problem: single full-array tile
    n_pad = _round_up(n, tm)
    num_tiles = n_pad // tm

    if n_pad != n:
        features = jnp.pad(features, ((0, n_pad - n), (0, 0)))

    out_row = pl.pallas_call(
        _gemv_kernel,
        out_shape=jax.ShapeDtypeStruct((1, n_pad), dtype),
        grid_spec=pltpu.PrefetchScalarGridSpec(
            num_scalar_prefetch=0,
            grid=(num_tiles,),
            in_specs=[
                # ws: grid-invariant block -> stays resident, DMA'd once.
                pl.BlockSpec((1, h), lambda i: (0, 0)),
                # features: streamed / double-buffered over the N tiles.
                pl.BlockSpec((tm, h), lambda i: (i, 0)),
            ],
            # lane-dense output: each step writes a (1, TM) column-block of
            # the single output row.
            out_specs=pl.BlockSpec((1, tm), lambda i: (0, i)),
        ),
        compiler_params=pltpu.CompilerParams(
            dimension_semantics=("parallel",),  # megacore-shardable on v7x
        ),
    )(ws, features)

    return out_row.reshape(n_pad)[:n]


if __name__ == "__main__":
    key = jax.random.PRNGKey(0)

    # -------- primary small config matching the module (hidden=32, nodes=8) --
    n_hidden = 32
    n_nodes = 8
    k_w, k_f, k_s, k_w2, k_f2, k_s2 = jax.random.split(key, 6)

    # Deterministic parameter init matching reset_parameters():
    # uniform(-1/sqrt(H), 1/sqrt(H))
    bound = 1.0 / math.sqrt(n_hidden)
    weight = jax.random.uniform(
        k_w, (n_hidden, n_hidden), dtype=jnp.float32, minval=-bound, maxval=bound
    )
    features = jax.random.normal(k_f, (n_nodes, n_hidden), dtype=jnp.float32)
    summary = jax.random.normal(k_s, (n_hidden,), dtype=jnp.float32)

    out = discriminator_forward(features, weight, summary)
    out = jax.block_until_ready(out)
    ref = features @ (weight @ summary)
    assert out.shape == (n_nodes,)
    assert jnp.allclose(out, ref, atol=1e-4, rtol=1e-4), (out, ref)

    # -------- secondary config exercising the tiled / padded path -----------
    n_hidden2 = 256
    n_nodes2 = 1000  # not a multiple of the 512-row tile -> padding path
    bound2 = 1.0 / math.sqrt(n_hidden2)
    weight2 = jax.random.uniform(
        k_w2, (n_hidden2, n_hidden2), dtype=jnp.float32, minval=-bound2, maxval=bound2
    )
    features2 = jax.random.normal(k_f2, (n_nodes2, n_hidden2), dtype=jnp.float32)
    summary2 = jax.random.normal(k_s2, (n_hidden2,), dtype=jnp.float32)

    out2 = discriminator_forward(features2, weight2, summary2)
    out2 = jax.block_until_ready(out2)
    ref2 = features2 @ (weight2 @ summary2)
    assert out2.shape == (n_nodes2,)
    assert jnp.allclose(out2, ref2, atol=1e-3, rtol=1e-3), (out2, ref2)

    # TODO(synk): optionally cast the streamed features to bf16 (f32 accumulate)
    # for extra HBM-bandwidth headroom on v5e.
    print("KERNEL_OK")
</pallas_src>

<mosaic_0001>
module attributes {stable_mosaic.version = 11 : i64} {
  func.func @_gemv_kernel(%arg0: i32, %arg1: memref<1x32xf32, #tpu.memory_space<vmem>>, %arg2: memref<8x32xf32, #tpu.memory_space<vmem>>, %arg3: memref<1x8xf32, #tpu.memory_space<vmem>>) attributes {dimension_semantics = [#tpu.dimension_semantics<parallel>], iteration_bounds = array<i64: 1>, scalar_prefetch = 0 : i64, scratch_operands = 0 : i64, tpu.core_type = #tpu.core_type<tc>, window_params = [{pipeline_mode = #tpu.pipeline_mode<synchronous>, transform_indices = @transform_0, window_bounds = array<i64: 1, 32>}, {transform_indices = @transform_1, window_bounds = array<i64: 8, 32>}, {transform_indices = @transform_2, window_bounds = array<i64: 1, 8>}]} {
    %c0 = arith.constant 0 : index
    %c0_0 = arith.constant 0 : index
    %0 = vector.load %arg1[%c0, %c0_0] : memref<1x32xf32, #tpu.memory_space<vmem>>, vector<1x32xf32>
    %c0_1 = arith.constant 0 : index
    %c0_2 = arith.constant 0 : index
    %1 = vector.load %arg2[%c0_1, %c0_2] : memref<8x32xf32, #tpu.memory_space<vmem>>, vector<8x32xf32>
    %cst = arith.constant dense<0.000000e+00> : vector<1x8xf32>
    %2 = tpu.matmul %0, %1, %cst {dimension_numbers = #tpu.dot_dimension_numbers<[1], [1], [0], [0], [0, 0, 1, 0], [], []>} : vector<1x32xf32>, vector<8x32xf32>, vector<1x8xf32> -> vector<1x8xf32>
    %c0_3 = arith.constant 0 : index
    %c0_4 = arith.constant 0 : index
    %3 = vector.load %arg3[%c0_3, %c0_4] : memref<1x8xf32, #tpu.memory_space<vmem>>, vector<1x8xf32>
    tpu.vector_store %arg3[%c0_3, %c0_4], %2 {strides = array<i32>} : memref<1x8xf32, #tpu.memory_space<vmem>>, vector<1x8xf32>,
    return
  }
  func.func @transform_0(%arg0: i32) -> (i32, i32) {
    %c0_i32 = arith.constant 0 : i32
    %c0_i32_0 = arith.constant 0 : i32
    %c0_i32_1 = arith.constant 0 : i32
    return %c0_i32, %c0_i32_0 : i32, i32
  }
  func.func @transform_1(%arg0: i32) -> (i32, i32) {
    %c0_i32 = arith.constant 0 : i32
    %c0_i32_0 = arith.constant 0 : i32
    return %arg0, %c0_i32 : i32, i32
  }
  func.func @transform_2(%arg0: i32) -> (i32, i32) {
    %c0_i32 = arith.constant 0 : i32
    %c0_i32_0 = arith.constant 0 : i32
    return %c0_i32, %arg0 : i32, i32
  }
}

</mosaic_0001>

<bundles_post_ra>
// kernel: tpu_custom_call.1
= control target key start
LH: loop header
LB: loop body
LE: loop exit
PB: predicated region body
PF: predicated region fallthrough
CT: control target
= control target key end

     0   :  { %7 = vsyncpa [#allocation3], 0  ;;  %s242_s0 = inlined_call_operand.hbm [shape: f32[1,32], index: 0, kind: input, shape index: {}]   ;;  %s243_s1 = inlined_call_operand.hbm [shape: f32[8,32], index: 1, kind: input, shape index: {}]   ;;  %s244_s2 = inlined_call_operand.hbm [shape: f32[1,8], index: 2, kind: output, shape index: {}]  }
   0x1   :  { %8 = vsyncpa [#allocation6], 0 }
   0x2   :  { %9 = vsyncpa [#allocation4], 0  ;;  %s213_s9 = smov [#allocation2]   ;;  %s214_s11 = smov [#allocation5]  }
   0x3   :  { %s16_s10 = sshll.u32 %s213_s9, 4  ;;  %s26_s12 = sshll.u32 %s214_s11, 4  ;;  %s17_s10 = int_to_ptr.vmem [resolvable:$true] %s16_s10  ;;  %s27_s12 = int_to_ptr.vmem [resolvable:$true] %s26_s12 }
   0x4   :  { %s155_s13 = scalar_lea.vmem %s17_s10, 16  ;;  %s159_s14 = scalar_lea.vmem %s17_s10, 32 }
   0x5   :  { %p156_p0 = scmp.ne.s32.totalorder %s17_s10, %s155_s13  ;;  %p160_p1 = scmp.lt.s32.totalorder %s17_s10, %s17_s10 }
   0x6   :  { %p161_p2 = scmp.lt.s32.totalorder %s159_s14, %s155_s13 }
   0x8   :  { %p162_p3 = por %p161_p2, %p160_p1 }
   0xa   :  { %p163_p4 = pnand %p162_p3, %p156_p0 }
   0xc   :  { %166 = shalt.err (!%p163_p4)
}
   0xd   :  { %19 = dma.hbm_to_vmem [thread:$0]  %s242_s0, 16, %s17_s10, [#allocation3]  }
   0xe   :  { %s175_s17 = scalar_lea.vmem %s27_s12, 128  ;;  %p180_p6 = scmp.lt.s32.totalorder %s27_s12, %s27_s12 }
   0xf   :  { %p176_p5 = scmp.ne.s32.totalorder %s27_s12, %s175_s17  ;;  %p181_p7 = scmp.lt.s32.totalorder %s175_s17, %s175_s17 }
  0x11   :  { %p182_p8 = por %p181_p7, %p180_p6 }
  0x13   :  { %p183_p9 = pnand %p182_p8, %p176_p5 }
  0x15   :  { %186 = shalt.err (!%p183_p9)
}
  0x16   :  { %29 = dma.hbm_to_vmem [thread:$0]  %s243_s1, 128, %s27_s12, [#allocation6]  }
  0x17   :  { %207 = dma.done.wait [#allocation3], 16  }
  0x18   :  { %208 = vsyncadd [#allocation3], 4294967280 }
  0x19   :  { %209 = dma.done.wait [#allocation6], 128  }
  0x1a   :  { %210 = vsyncadd [#allocation6], 4294967168  ;;  %v215_v0 = vmov 0.0   ;;  %vm216_vm0 = vmmov 0   ;;  %vm38_vm1 = vcmask 261120   ;;  %v37_v1 = vld [vmem:[#allocation5] sm:$0xff] }
  0x1b   :  { %137 = vmatprep.subr.mxu0 %v215_v0  ;;  %139 = vmatprep.mubr.msk.f32.mxu0 %vm216_vm0, %v215_v0  ;;  %v36_v2 = vld [vmem:[#allocation2] sm:$0x1]  ;;  %s217_s0 = smov [#allocation7]   ;;  %vm115_vm2 = vcmask 57344  }
  0x1c   :  { %138 = vmatpush3.xpose.msk.msra.mxu0 %vm38_vm1, %v37_v1  ;;  %s123_s20 = sshll.u32 %s217_s0, 4  ;;  %s124_s20 = int_to_ptr.vmem [resolvable:$true] %s123_s20 }
  0x1d   :  { %s187_s1 = scalar_lea.vmem %s124_s20, 16  ;;  %s191_s21 = scalar_lea.vmem %s124_s20, 32 }
  0x1e   :  { %p188_p10 = scmp.ne.s32.totalorder %s124_s20, %s187_s1  ;;  %p192_p11 = scmp.lt.s32.totalorder %s124_s20, %s124_s20 }
  0x1f   :  { %140 = vmatmul.mubr.msk.f32.vlgmr.msra.gmra.mxu0 %vm38_vm1, %v36_v2  ;;  %p193_p12 = scmp.lt.s32.totalorder %s191_s21, %s187_s1 }
  0x21   :  { %p194_p13 = por %p193_p12, %p192_p11 }
  0x23   :  { %p195_p0 = pnand %p194_p13, %p188_p10 }
  0xdf   :  { %v111_v3 = vpop.f32.mrf.mxu0 }
  0xe0   :  { %116 = vst.msk [vmem:[#allocation7] sm:$0x1] %vm115_vm2, %v111_v3 }
  0xe1   :  { %v141_v4 = vpop.f32.mrf.mxu0 }
  0xe2   :  { %198 = shalt.err (!%p195_p0)
}
  0xe3   :  { %126 = dma.vmem_to_hbm [thread:$0]  %s124_s20, 16, %s244_s2, [#allocation4]  }
  0xe4   :  { %211 = dma.done.wait [#allocation4], 16  }
  0xe5   :  { %212 = vsyncadd [#allocation4], 4294967280 }
  0xe6   :  { %130 = vsyncpa [#allocation3], 1 }
  0xe7   :  { %131 = vsyncpa [#allocation6], 1 }
  0xe8   :  { %132 = vsyncpa [#allocation4], 1 }

</bundles_post_ra>
